<compile_context>
chip_gen: v5e
topology: v5e:2x2
jax: 0.10.0
libtpu: 0.0.40
codegen_flags: <defaults>
</compile_context>

<pallas_src>
import functools

import jax
import jax.numpy as jnp
from jax import lax
from jax.experimental import pallas as pl
from jax.experimental.pallas import tpu as pltpu

FC1_IN = 32          # nn.Linear(32, hidden_dim) hard-codes in_features=32
FC3_OUT = 64         # nn.Linear(hidden_dim, 64)
LEAKY_SLOPE = 0.01   # F.leaky_relu default negative slope
BN_EPS = 1e-5        # nn.BatchNorm1d default eps

LANE = 128
SUBLANE = 8


def _round_up(n, m):
    return ((n + m - 1) // m) * m


def _leaky_relu(v):
    return jnp.where(v >= 0.0, v, LEAKY_SLOPE * v)


def _pad_last(a, size):
    pad = size - a.shape[-1]
    if pad == 0:
        return a
    return jnp.pad(a, [(0, 0)] * (a.ndim - 1) + [(0, pad)])


def _pad_rows(a, size):
    pad = size - a.shape[0]
    if pad == 0:
        return a
    return jnp.pad(a, [(0, pad)] + [(0, 0)] * (a.ndim - 1))


def _vmem_limit_bytes():
    """Generation-aware scoped-VMEM budget: ~3/4 of physical VMEM, <=96 MiB."""
    try:
        cap = int(getattr(pltpu.get_tpu_info(), "vmem_capacity_bytes"))
    except Exception:
        cap = 64 * 1024 * 1024      # conservative (v7x per-TC VMEM)
    return min((cap * 3) // 4, 96 * 1024 * 1024)


# ----------------------------------------------------------------------------------
# Fused single-kernel path: phase 0 = fc1 + stats (h resident in VMEM), phase 1 = rest
# ----------------------------------------------------------------------------------
def _fused_kernel(x_ref, w1_ref, b1_ref, gamma_ref, beta_ref,
                  w3_ref, b3_ref, w2_ref, b2_ref,
                  out_ref,
                  h_sc, sum_sc, sumsq_sc, scale_sc, shift_sc,
                  *, tile_b, batch):
    phase = pl.program_id(0)
    i = pl.program_id(1)

    @pl.when(phase == 0)
    def _():
        @pl.when(i == 0)
        def _():
            sum_sc[...] = jnp.zeros_like(sum_sc)
            sumsq_sc[...] = jnp.zeros_like(sumsq_sc)

        h = jnp.dot(x_ref[...], w1_ref[...],
                    preferred_element_type=jnp.float32) + b1_ref[...]
        h = _leaky_relu(h)
        # Rows past the true batch were zero-padded in the wrapper; leaky_relu(b1)
        # is nonzero there, so mask them out of both the stats and the stored h.
        row = i * tile_b + lax.broadcasted_iota(jnp.int32, (tile_b, 1), 0)
        h = jnp.where(row < batch, h, 0.0)

        off = pl.multiple_of(i * tile_b, SUBLANE)
        h_sc[pl.ds(off, tile_b), :] = h
        sum_sc[...] += jnp.sum(h, axis=0, keepdims=True)
        sumsq_sc[...] += jnp.sum(h * h, axis=0, keepdims=True)

    @pl.when(phase == 1)
    def _():
        @pl.when(i == 0)
        def _():
            # Fold full-batch stats into one scale/shift (train-mode, biased var).
            inv_b = 1.0 / batch
            mean = sum_sc[...] * inv_b
            var = jnp.maximum(sumsq_sc[...] * inv_b - mean * mean, 0.0)
            scale = gamma_ref[...] * lax.rsqrt(var + BN_EPS)
            scale_sc[...] = scale
            shift_sc[...] = beta_ref[...] - mean * scale

        off = pl.multiple_of(i * tile_b, SUBLANE)
        h = h_sc[pl.ds(off, tile_b), :]
        h = h * scale_sc[...] + shift_sc[...]
        h = jnp.dot(h, w3_ref[...], preferred_element_type=jnp.float32) + b3_ref[...]
        h = _leaky_relu(h)
        out_ref[...] = (jnp.dot(h, w2_ref[...], preferred_element_type=jnp.float32)
                        + b2_ref[...])


# ----------------------------------------------------------------------------------
# Fallback two-pass path (used when h does not fit in the VMEM scratch budget)
# ----------------------------------------------------------------------------------
def _stats_kernel(x_ref, w1_ref, b1_ref, sum_ref, sumsq_ref, *, tile_b, batch):
    """In-kernel accumulated BN statistics (resident (1,H) output blocks)."""
    i = pl.program_id(0)

    @pl.when(i == 0)
    def _():
        sum_ref[...] = jnp.zeros_like(sum_ref)
        sumsq_ref[...] = jnp.zeros_like(sumsq_ref)

    h = jnp.dot(x_ref[...], w1_ref[...],
                preferred_element_type=jnp.float32) + b1_ref[...]
    h = _leaky_relu(h)
    row = i * tile_b + lax.broadcasted_iota(jnp.int32, (tile_b, 1), 0)
    h = jnp.where(row < batch, h, 0.0)
    sum_ref[...] += jnp.sum(h, axis=0, keepdims=True)
    sumsq_ref[...] += jnp.sum(h * h, axis=0, keepdims=True)


def _forward_kernel(x_ref, w1_ref, b1_ref, scale_ref, shift_ref,
                    w3_ref, b3_ref, w2_ref, b2_ref, out_ref):
    """Recompute fc1, apply folded BN, fc3 -> leaky_relu -> fc2 for one batch tile."""
    h = jnp.dot(x_ref[...], w1_ref[...],
                preferred_element_type=jnp.float32) + b1_ref[...]
    h = _leaky_relu(h)
    h = h * scale_ref[...] + shift_ref[...]
    h = jnp.dot(h, w3_ref[...], preferred_element_type=jnp.float32) + b3_ref[...]
    h = _leaky_relu(h)
    out_ref[...] = (jnp.dot(h, w2_ref[...], preferred_element_type=jnp.float32)
                    + b2_ref[...])


@functools.partial(jax.jit, static_argnames=("tile_cap", "force_two_pass"))
def classifier_forward(x, params, *, tile_cap=2048, force_two_pass=False):
    """Training-mode forward pass of the torch `Classifier`."""
    b, f_in = x.shape
    assert f_in == FC1_IN, f"fc1 expects {FC1_IN} input features, got {f_in}"
    hidden = params["fc1_w"].shape[1]
    out_dim = params["fc2_w"].shape[1]

    # Lane-dense hidden dims (padding lives only in VMEM; zero columns/rows are
    # mathematically inert through leaky_relu / BN(gamma=0) / matmuls).
    h_pad = _round_up(hidden, LANE)
    f3_pad = _round_up(FC3_OUT, LANE)

    w1 = _pad_last(params["fc1_w"], h_pad)
    b1 = _pad_last(params["fc1_b"], h_pad)
    gamma = _pad_last(params["bn_gamma"], h_pad)
    beta = _pad_last(params["bn_beta"], h_pad)
    w3 = _pad_last(_pad_rows(params["fc3_w"], h_pad), f3_pad)
    b3 = _pad_last(params["fc3_b"], f3_pad)
    w2 = _pad_rows(params["fc2_w"], f3_pad)
    b2 = params["fc2_b"]

    # Large batch tiles: the kernel is HBM-bound on reading x; an x block at
    # tile_b=2048 is only 256 KiB per buffer, tiny vs VMEM on every generation.
    tile_b = min(int(tile_cap), _round_up(b, SUBLANE))
    tile_b = _round_up(tile_b, SUBLANE)
    n_tiles = pl.cdiv(b, tile_b)
    b_pad = n_tiles * tile_b
    if b_pad != b:
        x = jnp.pad(x, ((0, b_pad - b), (0, 0)))

    vmem_limit = _vmem_limit_bytes()
    h_scratch_bytes = b_pad * h_pad * 4
    fused_ok = (not force_two_pass) and (h_scratch_bytes <= vmem_limit // 2)

    if fused_ok:
        last = n_tiles - 1
        out = pl.pallas_call(
            functools.partial(_fused_kernel, tile_b=tile_b, batch=b),
            out_shape=jax.ShapeDtypeStruct((b_pad, out_dim), jnp.float32),
            grid=(2, n_tiles),
            in_specs=[
                # x: real tiles in phase 0; parked on the last tile in phase 1 so
                # no re-fetch happens across the whole forward phase.
                pl.BlockSpec((tile_b, FC1_IN),
                             lambda p, i: (i * (1 - p) + last * p, 0)),
                pl.BlockSpec((FC1_IN, h_pad), lambda p, i: (0, 0)),
                pl.BlockSpec((1, h_pad), lambda p, i: (0, 0)),
                pl.BlockSpec((1, h_pad), lambda p, i: (0, 0)),
                pl.BlockSpec((1, h_pad), lambda p, i: (0, 0)),
                pl.BlockSpec((h_pad, f3_pad), lambda p, i: (0, 0)),
                pl.BlockSpec((1, f3_pad), lambda p, i: (0, 0)),
                pl.BlockSpec((f3_pad, out_dim), lambda p, i: (0, 0)),
                pl.BlockSpec((1, out_dim), lambda p, i: (0, 0)),
            ],
            # Constant block 0 during phase 0 (never written), tile i in phase 1.
            out_specs=pl.BlockSpec((tile_b, out_dim), lambda p, i: (i * p, 0)),
            scratch_shapes=[
                pltpu.VMEM((b_pad, h_pad), jnp.float32),   # resident h
                pltpu.VMEM((1, h_pad), jnp.float32),       # sum(h)
                pltpu.VMEM((1, h_pad), jnp.float32),       # sum(h^2)
                pltpu.VMEM((1, h_pad), jnp.float32),       # folded BN scale
                pltpu.VMEM((1, h_pad), jnp.float32),       # folded BN shift
            ],
            compiler_params=pltpu.CompilerParams(
                dimension_semantics=("arbitrary", "arbitrary"),
                vmem_limit_bytes=vmem_limit,
            ),
        )(x, w1, b1, gamma, beta, w3, b3, w2, b2)
        return out[:b]

    # ---- fallback: two passes, stats accumulated in-kernel, fc1 recomputed -------
    sums, sumsqs = pl.pallas_call(
        functools.partial(_stats_kernel, tile_b=tile_b, batch=b),
        out_shape=(jax.ShapeDtypeStruct((1, h_pad), jnp.float32),
                   jax.ShapeDtypeStruct((1, h_pad), jnp.float32)),
        grid=(n_tiles,),
        in_specs=[
            pl.BlockSpec((tile_b, FC1_IN), lambda i: (i, 0)),
            pl.BlockSpec((FC1_IN, h_pad), lambda i: (0, 0)),
            pl.BlockSpec((1, h_pad), lambda i: (0, 0)),
        ],
        out_specs=(pl.BlockSpec((1, h_pad), lambda i: (0, 0)),
                   pl.BlockSpec((1, h_pad), lambda i: (0, 0))),
        compiler_params=pltpu.CompilerParams(
            dimension_semantics=("arbitrary",),   # resident accumulator across tiles
            vmem_limit_bytes=vmem_limit,
        ),
    )(x, w1, b1)

    mean = sums / b
    var = jnp.maximum(sumsqs / b - mean * mean, 0.0)
    scale = gamma * lax.rsqrt(var + BN_EPS)
    shift = beta - mean * scale

    out = pl.pallas_call(
        _forward_kernel,
        out_shape=jax.ShapeDtypeStruct((b_pad, out_dim), jnp.float32),
        grid=(n_tiles,),
        in_specs=[
            pl.BlockSpec((tile_b, FC1_IN), lambda i: (i, 0)),
            pl.BlockSpec((FC1_IN, h_pad), lambda i: (0, 0)),
            pl.BlockSpec((1, h_pad), lambda i: (0, 0)),
            pl.BlockSpec((1, h_pad), lambda i: (0, 0)),
            pl.BlockSpec((1, h_pad), lambda i: (0, 0)),
            pl.BlockSpec((h_pad, f3_pad), lambda i: (0, 0)),
            pl.BlockSpec((1, f3_pad), lambda i: (0, 0)),
            pl.BlockSpec((f3_pad, out_dim), lambda i: (0, 0)),
            pl.BlockSpec((1, out_dim), lambda i: (0, 0)),
        ],
        out_specs=pl.BlockSpec((tile_b, out_dim), lambda i: (i, 0)),
        compiler_params=pltpu.CompilerParams(
            dimension_semantics=("parallel",),
            vmem_limit_bytes=vmem_limit,
        ),
    )(x, w1, b1, scale, shift, w3, b3, w2, b2)
    return out[:b]


def init_params(key, hidden_dim, output_dim):
    """Linear weights stored pre-transposed as [in, out]; biases as [1, out]."""
    k = jax.random.split(key, 6)

    def lin(kw, kb, n_in, n_out):
        bound = 1.0 / (n_in ** 0.5)
        w = jax.random.uniform(kw, (n_in, n_out), jnp.float32, -bound, bound)
        bias = jax.random.uniform(kb, (1, n_out), jnp.float32, -bound, bound)
        return w, bias

    w1, b1 = lin(k[0], k[1], FC1_IN, hidden_dim)
    w3, b3 = lin(k[2], k[3], hidden_dim, FC3_OUT)
    w2, b2 = lin(k[4], k[5], FC3_OUT, output_dim)
    return {
        "fc1_w": w1, "fc1_b": b1,
        "bn_gamma": jnp.ones((1, hidden_dim), jnp.float32),
        "bn_beta": jnp.zeros((1, hidden_dim), jnp.float32),
        "fc3_w": w3, "fc3_b": b3,
        "fc2_w": w2, "fc2_b": b2,
    }


def classifier_reference(x, params):
    """Pure-JAX reference of the torch forward (train-mode BN)."""
    h = x @ params["fc1_w"] + params["fc1_b"]
    h = jnp.where(h >= 0.0, h, LEAKY_SLOPE * h)
    mean = jnp.mean(h, axis=0, keepdims=True)
    var = jnp.mean((h - mean) ** 2, axis=0, keepdims=True)
    h = (h - mean) * lax.rsqrt(var + BN_EPS) * params["bn_gamma"] + params["bn_beta"]
    h = h @ params["fc3_w"] + params["fc3_b"]
    h = jnp.where(h >= 0.0, h, LEAKY_SLOPE * h)
    return h @ params["fc2_w"] + params["fc2_b"]


if __name__ == "__main__":
    HIDDEN_DIM, OUTPUT_DIM = 64, 10

    root = jax.random.PRNGKey(0)
    k_x, k_p = jax.random.split(root)
    params = init_params(k_p, HIDDEN_DIM, OUTPUT_DIM)

    def check(batch, **kw):
        xb = jax.random.normal(jax.random.fold_in(k_x, batch),
                               (batch, FC1_IN), dtype=jnp.float32)
        out = classifier_forward(xb, params, **kw)
        jax.block_until_ready(out)
        assert out.shape == (batch, OUTPUT_DIM)
        ref = classifier_reference(xb, params)
        err = float(jnp.max(jnp.abs(out - ref)))
        assert jnp.allclose(out, ref, rtol=1e-3, atol=1e-3), f"max_abs_err={err}"

    check(20)                                      # fused path, single tile + row padding
    check(96, tile_cap=32)                         # fused path, multi-tile stats accumulation
    check(96, tile_cap=32, force_two_pass=True)    # two-pass fallback path
    print("KERNEL_OK")
</pallas_src>

<mosaic_0001>
module attributes {stable_mosaic.version = 11 : i64} {
  func.func @_fused_kernel(%arg0: i32, %arg1: i32, %arg2: memref<24x32xf32, #tpu.memory_space<vmem>>, %arg3: memref<32x128xf32, #tpu.memory_space<vmem>>, %arg4: memref<1x128xf32, #tpu.memory_space<vmem>>, %arg5: memref<1x128xf32, #tpu.memory_space<vmem>>, %arg6: memref<1x128xf32, #tpu.memory_space<vmem>>, %arg7: memref<128x128xf32, #tpu.memory_space<vmem>>, %arg8: memref<1x128xf32, #tpu.memory_space<vmem>>, %arg9: memref<128x10xf32, #tpu.memory_space<vmem>>, %arg10: memref<1x10xf32, #tpu.memory_space<vmem>>, %arg11: memref<24x10xf32, #tpu.memory_space<vmem>>, %arg12: memref<24x128xf32, #tpu.memory_space<vmem>>, %arg13: memref<1x128xf32, #tpu.memory_space<vmem>>, %arg14: memref<1x128xf32, #tpu.memory_space<vmem>>, %arg15: memref<1x128xf32, #tpu.memory_space<vmem>>, %arg16: memref<1x128xf32, #tpu.memory_space<vmem>>) attributes {dimension_semantics = [#tpu.dimension_semantics<arbitrary>, #tpu.dimension_semantics<arbitrary>], iteration_bounds = array<i64: 2, 1>, scalar_prefetch = 0 : i64, scratch_operands = 5 : i64, tpu.core_type = #tpu.core_type<tc>, window_params = [{transform_indices = @transform_0, window_bounds = array<i64: 24, 32>}, {pipeline_mode = #tpu.pipeline_mode<synchronous>, transform_indices = @transform_1, window_bounds = array<i64: 32, 128>}, {pipeline_mode = #tpu.pipeline_mode<synchronous>, transform_indices = @transform_2, window_bounds = array<i64: 1, 128>}, {pipeline_mode = #tpu.pipeline_mode<synchronous>, transform_indices = @transform_3, window_bounds = array<i64: 1, 128>}, {pipeline_mode = #tpu.pipeline_mode<synchronous>, transform_indices = @transform_4, window_bounds = array<i64: 1, 128>}, {pipeline_mode = #tpu.pipeline_mode<synchronous>, transform_indices = @transform_5, window_bounds = array<i64: 128, 128>}, {pipeline_mode = #tpu.pipeline_mode<synchronous>, transform_indices = @transform_6, window_bounds = array<i64: 1, 128>}, {pipeline_mode = #tpu.pipeline_mode<synchronous>, transform_indices = @transform_7, window_bounds = array<i64: 128, 10>}, {pipeline_mode = #tpu.pipeline_mode<synchronous>, transform_indices = @transform_8, window_bounds = array<i64: 1, 10>}, {transform_indices = @transform_9, window_bounds = array<i64: 24, 10>}]} {
    %c0_i32 = arith.constant 0 : i32
    %0 = arith.cmpi eq, %arg0, %c0_i32 : i32
    %1 = arith.extui %0 : i1 to i32
    %c0_i32_0 = arith.constant 0 : i32
    %2 = arith.cmpi ne, %1, %c0_i32_0 : i32
    scf.if %2 {
      %c0_i32_2 = arith.constant 0 : i32
      %6 = arith.cmpi eq, %arg1, %c0_i32_2 : i32
      %7 = arith.extui %6 : i1 to i32
      %c0_i32_3 = arith.constant 0 : i32
      %8 = arith.cmpi ne, %7, %c0_i32_3 : i32
      scf.if %8 {
        %cst_24 = arith.constant 0.000000e+00 : f32
        %45 = vector.broadcast %cst_24 : f32 to vector<1x128xf32>
        %c0_25 = arith.constant 0 : index
        %c0_26 = arith.constant 0 : index
        %46 = vector.load %arg13[%c0_25, %c0_26] : memref<1x128xf32, #tpu.memory_space<vmem>>, vector<1x128xf32>
        tpu.vector_store %arg13[%c0_25, %c0_26], %45 {strides = array<i32>} : memref<1x128xf32, #tpu.memory_space<vmem>>, vector<1x128xf32>,
        %cst_27 = arith.constant 0.000000e+00 : f32
        %47 = vector.broadcast %cst_27 : f32 to vector<1x128xf32>
        %c0_28 = arith.constant 0 : index
        %c0_29 = arith.constant 0 : index
        %48 = vector.load %arg14[%c0_28, %c0_29] : memref<1x128xf32, #tpu.memory_space<vmem>>, vector<1x128xf32>
        tpu.vector_store %arg14[%c0_28, %c0_29], %47 {strides = array<i32>} : memref<1x128xf32, #tpu.memory_space<vmem>>, vector<1x128xf32>,
      } else {
      }
      %c0 = arith.constant 0 : index
      %c0_4 = arith.constant 0 : index
      %9 = vector.load %arg2[%c0, %c0_4] : memref<24x32xf32, #tpu.memory_space<vmem>>, vector<24x32xf32>
      %c0_5 = arith.constant 0 : index
      %c0_6 = arith.constant 0 : index
      %10 = vector.load %arg3[%c0_5, %c0_6] : memref<32x128xf32, #tpu.memory_space<vmem>>, vector<32x128xf32>
      %cst = arith.constant dense<0.000000e+00> : vector<24x128xf32>
      %11 = tpu.matmul %9, %10, %cst {dimension_numbers = #tpu.dot_dimension_numbers<[1], [0], [0], [1], [0, 0, 1, 1], [], []>} : vector<24x32xf32>, vector<32x128xf32>, vector<24x128xf32> -> vector<24x128xf32>
      %c0_7 = arith.constant 0 : index
      %c0_8 = arith.constant 0 : index
      %12 = vector.load %arg4[%c0_7, %c0_8] : memref<1x128xf32, #tpu.memory_space<vmem>>, vector<1x128xf32>
      %13 = vector.broadcast %12 : vector<1x128xf32> to vector<24x128xf32>
      %14 = arith.addf %11, %13 : vector<24x128xf32>
      %cst_9 = arith.constant 0.000000e+00 : f32
      %15 = vector.broadcast %cst_9 : f32 to vector<24x128xf32>
      %16 = arith.cmpf oge, %14, %15 : vector<24x128xf32>
      %cst_10 = arith.constant 0.00999999977 : f32
      %17 = vector.broadcast %cst_10 : f32 to vector<24x128xf32>
      %18 = arith.mulf %17, %14 : vector<24x128xf32>
      %19 = arith.select %16, %14, %18 : vector<24x128xi1>, vector<24x128xf32>
      %c24_i32 = arith.constant 24 : i32
      %20 = arith.muli %arg1, %c24_i32 : i32
      %21 = tpu.iota {dimensions = array<i32: 0>} : vector<24x1xi32>
      %22 = vector.broadcast %20 : i32 to vector<24x1xi32>
      %23 = arith.addi %22, %21 : vector<24x1xi32>
      %c20_i32 = arith.constant 20 : i32
      %24 = vector.broadcast %c20_i32 : i32 to vector<24x1xi32>
      %25 = arith.cmpi slt, %23, %24 : vector<24x1xi32>
      %cst_11 = arith.constant 0.000000e+00 : f32
      %26 = vector.shape_cast %25 : vector<24x1xi1> to vector<24x1xi1>
      %27 = vector.broadcast %26 : vector<24x1xi1> to vector<24x128xi1>
      %28 = vector.broadcast %cst_11 : f32 to vector<24x128xf32>
      %29 = arith.select %27, %19, %28 : vector<24x128xi1>, vector<24x128xf32>
      %c24_i32_12 = arith.constant 24 : i32
      %30 = arith.muli %arg1, %c24_i32_12 : i32
      %31 = tpu.assume_multiple %30, 8 : i32
      %32 = arith.index_cast %31 : i32 to index
      %c0_13 = arith.constant 0 : index
      %33 = vector.load %arg12[%32, %c0_13] : memref<24x128xf32, #tpu.memory_space<vmem>>, vector<24x128xf32>
      tpu.vector_store %arg12[%32, %c0_13], %29 {strides = array<i32>} : memref<24x128xf32, #tpu.memory_space<vmem>>, vector<24x128xf32>,
      %c0_14 = arith.constant 0 : index
      %c0_15 = arith.constant 0 : index
      %34 = vector.load %arg13[%c0_14, %c0_15] : memref<1x128xf32, #tpu.memory_space<vmem>>, vector<1x128xf32>
      %cst_16 = arith.constant dense<0.000000e+00> : vector<128xf32>
      %35 = vector.multi_reduction <add>, %29, %cst_16 [0] : vector<24x128xf32> to vector<128xf32>
      %36 = vector.shape_cast %35 : vector<128xf32> to vector<1x128xf32>
      %37 = arith.addf %34, %36 : vector<1x128xf32>
      %c0_17 = arith.constant 0 : index
      %c0_18 = arith.constant 0 : index
      %38 = vector.load %arg13[%c0_17, %c0_18] : memref<1x128xf32, #tpu.memory_space<vmem>>, vector<1x128xf32>
      tpu.vector_store %arg13[%c0_17, %c0_18], %37 {strides = array<i32>} : memref<1x128xf32, #tpu.memory_space<vmem>>, vector<1x128xf32>,
      %c0_19 = arith.constant 0 : index
      %c0_20 = arith.constant 0 : index
      %39 = vector.load %arg14[%c0_19, %c0_20] : memref<1x128xf32, #tpu.memory_space<vmem>>, vector<1x128xf32>
      %40 = arith.mulf %29, %29 : vector<24x128xf32>
      %cst_21 = arith.constant dense<0.000000e+00> : vector<128xf32>
      %41 = vector.multi_reduction <add>, %40, %cst_21 [0] : vector<24x128xf32> to vector<128xf32>
      %42 = vector.shape_cast %41 : vector<128xf32> to vector<1x128xf32>
      %43 = arith.addf %39, %42 : vector<1x128xf32>
      %c0_22 = arith.constant 0 : index
      %c0_23 = arith.constant 0 : index
      %44 = vector.load %arg14[%c0_22, %c0_23] : memref<1x128xf32, #tpu.memory_space<vmem>>, vector<1x128xf32>
      tpu.vector_store %arg14[%c0_22, %c0_23], %43 {strides = array<i32>} : memref<1x128xf32, #tpu.memory_space<vmem>>, vector<1x128xf32>,
    } else {
    }
    %c1_i32 = arith.constant 1 : i32
    %3 = arith.cmpi eq, %arg0, %c1_i32 : i32
    %4 = arith.extui %3 : i1 to i32
    %c0_i32_1 = arith.constant 0 : i32
    %5 = arith.cmpi ne, %4, %c0_i32_1 : i32
    scf.if %5 {
      %c0_i32_2 = arith.constant 0 : i32
      %6 = arith.cmpi eq, %arg1, %c0_i32_2 : i32
      %7 = arith.extui %6 : i1 to i32
      %c0_i32_3 = arith.constant 0 : i32
      %8 = arith.cmpi ne, %7, %c0_i32_3 : i32
      scf.if %8 {
        %c0_21 = arith.constant 0 : index
        %c0_22 = arith.constant 0 : index
        %35 = vector.load %arg13[%c0_21, %c0_22] : memref<1x128xf32, #tpu.memory_space<vmem>>, vector<1x128xf32>
        %cst_23 = arith.constant 5.000000e-02 : f32
        %36 = vector.broadcast %cst_23 : f32 to vector<1x128xf32>
        %37 = arith.mulf %35, %36 : vector<1x128xf32>
        %c0_24 = arith.constant 0 : index
        %c0_25 = arith.constant 0 : index
        %38 = vector.load %arg14[%c0_24, %c0_25] : memref<1x128xf32, #tpu.memory_space<vmem>>, vector<1x128xf32>
        %cst_26 = arith.constant 5.000000e-02 : f32
        %39 = vector.broadcast %cst_26 : f32 to vector<1x128xf32>
        %40 = arith.mulf %38, %39 : vector<1x128xf32>
        %41 = arith.mulf %37, %37 : vector<1x128xf32>
        %42 = arith.subf %40, %41 : vector<1x128xf32>
        %cst_27 = arith.constant 0.000000e+00 : f32
        %43 = vector.broadcast %cst_27 : f32 to vector<1x128xf32>
        %44 = arith.maximumf %42, %43 : vector<1x128xf32>
        %c0_28 = arith.constant 0 : index
        %c0_29 = arith.constant 0 : index
        %45 = vector.load %arg5[%c0_28, %c0_29] : memref<1x128xf32, #tpu.memory_space<vmem>>, vector<1x128xf32>
        %cst_30 = arith.constant 9.99999974E-6 : f32
        %46 = vector.broadcast %cst_30 : f32 to vector<1x128xf32>
        %47 = arith.addf %44, %46 : vector<1x128xf32>
        %48 = math.rsqrt %47 : vector<1x128xf32>
        %49 = arith.mulf %45, %48 : vector<1x128xf32>
        %c0_31 = arith.constant 0 : index
        %c0_32 = arith.constant 0 : index
        %50 = vector.load %arg15[%c0_31, %c0_32] : memref<1x128xf32, #tpu.memory_space<vmem>>, vector<1x128xf32>
        tpu.vector_store %arg15[%c0_31, %c0_32], %49 {strides = array<i32>} : memref<1x128xf32, #tpu.memory_space<vmem>>, vector<1x128xf32>,
        %c0_33 = arith.constant 0 : index
        %c0_34 = arith.constant 0 : index
        %51 = vector.load %arg6[%c0_33, %c0_34] : memref<1x128xf32, #tpu.memory_space<vmem>>, vector<1x128xf32>
        %52 = arith.mulf %37, %49 : vector<1x128xf32>
        %53 = arith.subf %51, %52 : vector<1x128xf32>
        %c0_35 = arith.constant 0 : index
        %c0_36 = arith.constant 0 : index
        %54 = vector.load %arg16[%c0_35, %c0_36] : memref<1x128xf32, #tpu.memory_space<vmem>>, vector<1x128xf32>
        tpu.vector_store %arg16[%c0_35, %c0_36], %53 {strides = array<i32>} : memref<1x128xf32, #tpu.memory_space<vmem>>, vector<1x128xf32>,
      } else {
      }
      %c24_i32 = arith.constant 24 : i32
      %9 = arith.muli %arg1, %c24_i32 : i32
      %10 = tpu.assume_multiple %9, 8 : i32
      %11 = arith.index_cast %10 : i32 to index
      %c0 = arith.constant 0 : index
      %12 = vector.load %arg12[%11, %c0] : memref<24x128xf32, #tpu.memory_space<vmem>>, vector<24x128xf32>
      %c0_4 = arith.constant 0 : index
      %c0_5 = arith.constant 0 : index
      %13 = vector.load %arg15[%c0_4, %c0_5] : memref<1x128xf32, #tpu.memory_space<vmem>>, vector<1x128xf32>
      %14 = vector.broadcast %13 : vector<1x128xf32> to vector<24x128xf32>
      %15 = arith.mulf %12, %14 : vector<24x128xf32>
      %c0_6 = arith.constant 0 : index
      %c0_7 = arith.constant 0 : index
      %16 = vector.load %arg16[%c0_6, %c0_7] : memref<1x128xf32, #tpu.memory_space<vmem>>, vector<1x128xf32>
      %17 = vector.broadcast %16 : vector<1x128xf32> to vector<24x128xf32>
      %18 = arith.addf %15, %17 : vector<24x128xf32>
      %c0_8 = arith.constant 0 : index
      %c0_9 = arith.constant 0 : index
      %19 = vector.load %arg7[%c0_8, %c0_9] : memref<128x128xf32, #tpu.memory_space<vmem>>, vector<128x128xf32>
      %cst = arith.constant dense<0.000000e+00> : vector<24x128xf32>
      %20 = tpu.matmul %18, %19, %cst {dimension_numbers = #tpu.dot_dimension_numbers<[1], [0], [0], [1], [0, 0, 1, 1], [], []>} : vector<24x128xf32>, vector<128x128xf32>, vector<24x128xf32> -> vector<24x128xf32>
      %c0_10 = arith.constant 0 : index
      %c0_11 = arith.constant 0 : index
      %21 = vector.load %arg8[%c0_10, %c0_11] : memref<1x128xf32, #tpu.memory_space<vmem>>, vector<1x128xf32>
      %22 = vector.broadcast %21 : vector<1x128xf32> to vector<24x128xf32>
      %23 = arith.addf %20, %22 : vector<24x128xf32>
      %cst_12 = arith.constant 0.000000e+00 : f32
      %24 = vector.broadcast %cst_12 : f32 to vector<24x128xf32>
      %25 = arith.cmpf oge, %23, %24 : vector<24x128xf32>
      %cst_13 = arith.constant 0.00999999977 : f32
      %26 = vector.broadcast %cst_13 : f32 to vector<24x128xf32>
      %27 = arith.mulf %26, %23 : vector<24x128xf32>
      %28 = arith.select %25, %23, %27 : vector<24x128xi1>, vector<24x128xf32>
      %c0_14 = arith.constant 0 : index
      %c0_15 = arith.constant 0 : index
      %29 = vector.load %arg9[%c0_14, %c0_15] : memref<128x10xf32, #tpu.memory_space<vmem>>, vector<128x10xf32>
      %cst_16 = arith.constant dense<0.000000e+00> : vector<24x10xf32>
      %30 = tpu.matmul %28, %29, %cst_16 {dimension_numbers = #tpu.dot_dimension_numbers<[1], [0], [0], [1], [0, 0, 1, 1], [], []>} : vector<24x128xf32>, vector<128x10xf32>, vector<24x10xf32> -> vector<24x10xf32>
      %c0_17 = arith.constant 0 : index
      %c0_18 = arith.constant 0 : index
      %31 = vector.load %arg10[%c0_17, %c0_18] : memref<1x10xf32, #tpu.memory_space<vmem>>, vector<1x10xf32>
      %32 = vector.broadcast %31 : vector<1x10xf32> to vector<24x10xf32>
      %33 = arith.addf %30, %32 : vector<24x10xf32>
      %c0_19 = arith.constant 0 : index
      %c0_20 = arith.constant 0 : index
      %34 = vector.load %arg11[%c0_19, %c0_20] : memref<24x10xf32, #tpu.memory_space<vmem>>, vector<24x10xf32>
      tpu.vector_store %arg11[%c0_19, %c0_20], %33 {strides = array<i32>} : memref<24x10xf32, #tpu.memory_space<vmem>>, vector<24x10xf32>,
    } else {
    }
    return
  }
  func.func @transform_0(%arg0: i32, %arg1: i32) -> (i32, i32) {
    %c1_i32 = arith.constant 1 : i32
    %0 = arith.subi %c1_i32, %arg0 : i32
    %1 = arith.muli %arg1, %0 : i32
    %c0_i32 = arith.constant 0 : i32
    %2 = arith.muli %c0_i32, %arg0 : i32
    %3 = arith.addi %1, %2 : i32
    %c0_i32_0 = arith.constant 0 : i32
    %c0_i32_1 = arith.constant 0 : i32
    return %3, %c0_i32_0 : i32, i32
  }
  func.func @transform_1(%arg0: i32, %arg1: i32) -> (i32, i32) {
    %c0_i32 = arith.constant 0 : i32
    %c0_i32_0 = arith.constant 0 : i32
    %c0_i32_1 = arith.constant 0 : i32
    return %c0_i32, %c0_i32_0 : i32, i32
  }
  func.func @transform_2(%arg0: i32, %arg1: i32) -> (i32, i32) {
    %c0_i32 = arith.constant 0 : i32
    %c0_i32_0 = arith.constant 0 : i32
    %c0_i32_1 = arith.constant 0 : i32
    return %c0_i32, %c0_i32_0 : i32, i32
  }
  func.func @transform_3(%arg0: i32, %arg1: i32) -> (i32, i32) {
    %c0_i32 = arith.constant 0 : i32
    %c0_i32_0 = arith.constant 0 : i32
    %c0_i32_1 = arith.constant 0 : i32
    return %c0_i32, %c0_i32_0 : i32, i32
  }
  func.func @transform_4(%arg0: i32, %arg1: i32) -> (i32, i32) {
    %c0_i32 = arith.constant 0 : i32
    %c0_i32_0 = arith.constant 0 : i32
    %c0_i32_1 = arith.constant 0 : i32
    return %c0_i32, %c0_i32_0 : i32, i32
  }
  func.func @transform_5(%arg0: i32, %arg1: i32) -> (i32, i32) {
    %c0_i32 = arith.constant 0 : i32
    %c0_i32_0 = arith.constant 0 : i32
    %c0_i32_1 = arith.constant 0 : i32
    return %c0_i32, %c0_i32_0 : i32, i32
  }
  func.func @transform_6(%arg0: i32, %arg1: i32) -> (i32, i32) {
    %c0_i32 = arith.constant 0 : i32
    %c0_i32_0 = arith.constant 0 : i32
    %c0_i32_1 = arith.constant 0 : i32
    return %c0_i32, %c0_i32_0 : i32, i32
  }
  func.func @transform_7(%arg0: i32, %arg1: i32) -> (i32, i32) {
    %c0_i32 = arith.constant 0 : i32
    %c0_i32_0 = arith.constant 0 : i32
    %c0_i32_1 = arith.constant 0 : i32
    return %c0_i32, %c0_i32_0 : i32, i32
  }
  func.func @transform_8(%arg0: i32, %arg1: i32) -> (i32, i32) {
    %c0_i32 = arith.constant 0 : i32
    %c0_i32_0 = arith.constant 0 : i32
    %c0_i32_1 = arith.constant 0 : i32
    return %c0_i32, %c0_i32_0 : i32, i32
  }
  func.func @transform_9(%arg0: i32, %arg1: i32) -> (i32, i32) {
    %0 = arith.muli %arg1, %arg0 : i32
    %c0_i32 = arith.constant 0 : i32
    %c0_i32_0 = arith.constant 0 : i32
    return %0, %c0_i32 : i32, i32
  }
}

</mosaic_0001>

<bundles_post_ra>
// kernel: classifier_forward.1
= control target key start
LH: loop header
LB: loop body
LE: loop exit
PB: predicated region body
PF: predicated region fallthrough
CT: control target
= control target key end

     0   :  { %s874_s30 = smov 0   ;;  %s876_s10 = smov 0   ;;  %s1051_s0 = inlined_call_operand.vmem [shape: f32[24,32], index: 0, kind: input, shape index: {}]   ;;  %s1052_s1 = inlined_call_operand.vmem [shape: f32[32,128], index: 1, kind: input, shape index: {}]   ;;  %s1053_s2 = inlined_call_operand.vmem [shape: f32[1,128], index: 2, kind: input, shape index: {}]   ;;  %s1054_s3 = inlined_call_operand.vmem [shape: f32[1,128], index: 3, kind: input, shape index: {}]   ;;  %s1055_s4 = inlined_call_operand.vmem [shape: f32[1,128], index: 4, kind: input, shape index: {}]   ;;  %s1056_s5 = inlined_call_operand.vmem [shape: f32[128,128], index: 5, kind: input, shape index: {}]   ;;  %s1057_s6 = inlined_call_operand.vmem [shape: f32[1,128], index: 6, kind: input, shape index: {}]   ;;  %s1058_s7 = inlined_call_operand.vmem [shape: f32[128,10], index: 7, kind: input, shape index: {}]   ;;  %s1059_s8 = inlined_call_operand.vmem [shape: f32[1,10], index: 8, kind: input, shape index: {}]   ;;  %s1060_s9 = inlined_call_operand.vmem [shape: f32[24,10], index: 9, kind: output, shape index: {}]  }
   0x1   :  { %s878_s11 = smov 0  }
   0x2 LB: > { %s31_s12 = sadd.s32 1, %s817_s10  ;;  %p717_p0 = scmp.ge.s32.totalorder %s821_s11, 1  ;;  %s821_s11 = sphi %s878_s11, %s19_s11   ;;  %s817_s10 = sphi %s876_s10, %s1062_s10   ;;  %s813_s30 = sphi %s874_s30, %s1061_s30  }
   0x3   : > { %p33_p1 = scmp.ge.s32.totalorder %s31_s12, 2  ;;  %p310_p2 = scmp.lt.s32.totalorder %s821_s11, 3 }
   0x5   : > { %s1064_s12 = smov (%p33_p1, %s31_s12), 0  ;;  %p311_p3 = pnand %p717_p0, %p310_p2 }
   0x6   : > { %p718_p4 = scmp.ne.s32.totalorder (!%p311_p3), %s813_s30, 0 }
   0x7   : > { %314 = sbr.rel (%p311_p3) target bundleno = 515 (0x203), region = 56 }
   0xc   : > { %370 = sbr.rel (%p718_p4) target bundleno = 182 (0xb6), region = 60 }
  0x11   : > { %v383_v0 = vld [vmem:[%s1052_s1 + $0x18] sm:$0xff]  ;;  %v382_v1 = vld [vmem:[%s1052_s1 + $0x10] sm:$0xff]  ;;  %v381_v2 = vld [vmem:[%s1052_s1 + $0x8] sm:$0xff]  ;;  %vm388_vm0 = vcmask 261120   ;;  %v823_v7 = vmov 0.0   ;;  %v434_v8 = vlaneseq }
  0x12   : > { %728 = vmatpush.msra.mxu2 %v383_v0  ;;  %410 = vmatpush.msra.mxu0 %v383_v0  ;;  %v380_v3 = vld [vmem:[%s1052_s1] sm:$0xff]  ;;  %v379_v4 = vld [vmem:[%s1051_s0 + $0x10] sm:$0xff]  ;;  %v378_v6 = vld [vmem:[%s1051_s0 + $0x8] sm:$0xff]  ;;  %375 = vst [vmem:[#allocation3] sm:$0x1] %v823_v7 }
  0x13   : > { %727 = vmatpush.msra.mxu1 %v383_v0  ;;  %v377_v5 = vld [vmem:[%s1051_s0] sm:$0xff]  ;;  %376 = vst [vmem:[#allocation4] sm:$0x1] %v823_v7  ;;  %v435_v10 = vshrl.u32 %v434_v8, 7 }
  0x14   : > { %730 = vmatpush.msra.mxu2 %v382_v1  ;;  %411 = vmatpush.msra.mxu0 %v382_v1  ;;  %v792_v9 = vld [vmem:[%s1053_s2] ss:$0 sm:$0xff] }
  0x15   : > { %729 = vmatpush.msra.mxu1 %v382_v1  ;;  %v437_v15 = vadd.s32 16, %v435_v10 }
  0x16   : > { %732 = vmatpush.msra.mxu2 %v381_v2  ;;  %412 = vmatpush.msra.mxu0 %v381_v2 }
  0x17   : > { %731 = vmatpush.msra.mxu1 %v381_v2  ;;  %vm444_vm3 = vcmp.lt.s32.totalorder %v437_v15, 20 }
  0x18   : > { %734 = vmatpush.msra.mxu2 %v380_v3  ;;  %413 = vmatpush.msra.mxu0 %v380_v3 }
  0x19   : > { %721 = vmatmul.msk.f32.vlgmr.msra.gmra.mxu2 %vm388_vm0, %v379_v4  ;;  %733 = vmatpush.msra.mxu1 %v380_v3  ;;  %v458_v41 = vld [vmem:[#allocation3] sm:$0x1] }
  0x1a   : > { %719 = vmatmul.msk.f32.vlgmr.msra.gmra.mxu0 %vm388_vm0, %v377_v5  ;;  %720 = vmatmul.msk.f32.vlgmr.msra.gmra.mxu1 %vm388_vm0, %v378_v6  ;;  %v469_v44 = vld [vmem:[#allocation4] sm:$0x1] }
  0x97   : > { %v415_v11 = vpop.f32.mrf.mxu0  ;;  %v418_v12 = vpop.f32.mrf.mxu1 }
  0x98   : > { %v416_v13 = vadd.f32 %v792_v9, %v415_v11  ;;  %v419_v14 = vadd.f32 %v792_v9, %v418_v12 }
  0x9a   : > { %vm424_vm1 = vcmp.ge.f32.partialorder %v416_v13, 0.0  ;;  %v427_v16 = vmul.f32 0.01, %v416_v13  ;;  %vm425_vm2 = vcmp.ge.f32.partialorder %v419_v14, 0.0  ;;  %v428_v17 = vmul.f32 0.01, %v419_v14 }
  0x9c   : > { %v430_v18 = vsel %vm424_vm1, %v416_v13, %v427_v16  ;;  %v431_v19 = vsel %vm425_vm2, %v419_v14, %v428_v17  ;;  %v421_v20 = vpop.f32.mrf.mxu2 }
  0x9d   : > { %455 = vst [vmem:[#allocation2 + $0x10] sm:$0xff] %v430_v18  ;;  %v422_v21 = vadd.f32 %v792_v9, %v421_v20  ;;  %v470_v22 = vmul.f32 %v430_v18, %v430_v18  ;;  %v471_v23 = vmul.f32 %v431_v19, %v431_v19  ;;  %v459_v25 = vadd.f32 %v431_v19, %v430_v18 }
  0x9e   : > { %456 = vst [vmem:[#allocation2] sm:$0xff] %v431_v19 }
  0x9f   : > { %vm426_vm4 = vcmp.ge.f32.partialorder %v422_v21, 0.0  ;;  %v429_v24 = vmul.f32 0.01, %v422_v21  ;;  %v473_v28 = vadd.f32 %v471_v23, %v470_v22 }
  0xa1   : > { %v432_v26 = vsel %vm426_vm4, %v422_v21, %v429_v24 }
  0xa2   : > { %v453_v27 = vsel %vm444_vm3, %v432_v26, 0.0 }
  0xa3   : > { %457 = vst [vmem:[#allocation2 + $0x8] sm:$0xff] %v453_v27  ;;  %v460_v29 = vadd.f32 %v459_v25, %v453_v27  ;;  %v472_v30 = vmul.f32 %v453_v27, %v453_v27 }
  0xa5   : > { %v461_v31 = vrot.slane %v460_v29, 4  ;;  %v474_v32 = vadd.f32 %v473_v28, %v472_v30 }
  0xa7   : > { %v462_v33 = vadd.f32 %v461_v31, %v460_v29  ;;  %v475_v34 = vrot.slane %v474_v32, 4 }
  0xa9   : > { %v463_v35 = vrot.slane %v462_v33, 2  ;;  %v476_v36 = vadd.f32 %v475_v34, %v474_v32 }
  0xab   : > { %v464_v37 = vadd.f32 %v463_v35, %v462_v33  ;;  %v477_v38 = vrot.slane %v476_v36, 2 }
  0xad   : > { %v465_v39 = vrot.slane %v464_v37, 1  ;;  %v478_v40 = vadd.f32 %v477_v38, %v476_v36 }
  0xaf   : > { %v466_v42 = vadd.f32 %v465_v39, %v464_v37  ;;  %v479_v43 = vrot.slane %v478_v40, 1 }
  0xb1   : > { %v467_v45 = vadd.f32 %v466_v42, %v458_v41  ;;  %v480_v46 = vadd.f32 %v479_v43, %v478_v40 }
  0xb3   : > { %468 = vst [vmem:[#allocation3] sm:$0x1] %v467_v45  ;;  %v481_v47 = vadd.f32 %v480_v46, %v469_v44 }
  0xb5   : > { %482 = vst [vmem:[#allocation4] sm:$0x1] %v481_v47 }
  0xb6 PF: > { %p722_p5 = scmp.ne.s32.totalorder %s813_s30, 1 }
  0xb8   : > { %486 = sbr.rel (%p722_p5) target bundleno = 515 (0x203), region = 68 }
  0xbd   : > { %v550_v48 = vld [vmem:[%s1056_s5 + $0x78] sm:$0xff]  ;;  %v549_v49 = vld [vmem:[%s1056_s5 + $0x70] sm:$0xff]  ;;  %v548_v50 = vld [vmem:[%s1056_s5 + $0x68] sm:$0xff]  ;;  %vm636_vm11 = vcmask 80896  }
  0xbe   : > { %735 = vmatpush.msra.mxu2 %v550_v48  ;;  %555 = vmatpush.msra.mxu0 %v550_v48  ;;  %v547_v51 = vld [vmem:[%s1056_s5 + $0x60] sm:$0xff]  ;;  %v491_v52 = vld [vmem:[#allocation3] sm:$0x1]  ;;  %v493_v53 = vld [vmem:[#allocation4] sm:$0x1] }
  0xbf   : > { %v546_v54 = vld [vmem:[%s1056_s5 + $0x58] sm:$0xff]  ;;  %v935_v55 = vmul.f32 0.05, %v491_v52  ;;  %v494_v56 = vmul.f32 0.05, %v493_v53  ;;  %v545_v57 = vld [vmem:[%s1056_s5 + $0x50] sm:$0xff] }
  0xc0   : > { %736 = vmatpush.msra.mxu2 %v549_v49  ;;  %556 = vmatpush.msra.mxu0 %v549_v49  ;;  %v544_v59 = vld [vmem:[%s1056_s5 + $0x48] sm:$0xff]  ;;  %v543_v61 = vld [vmem:[%s1056_s5 + $0x40] sm:$0xff]  ;;  %v542_v63 = vld [vmem:[%s1056_s5 + $0x38] sm:$0xff] }
  0xc1   : > { %v495_v58 = vmul.f32 %v935_v55, %v935_v55  ;;  %v541_v1 = vld [vmem:[%s1056_s5 + $0x30] sm:$0xff]  ;;  %v540_v2 = vld [vmem:[%s1056_s5 + $0x28] sm:$0xff]  ;;  %v539_v3 = vld [vmem:[%s1056_s5 + $0x20] sm:$0xff] }
  0xc2   : > { %737 = vmatpush.msra.mxu2 %v548_v50  ;;  %557 = vmatpush.msra.mxu0 %v548_v50  ;;  %v538_v5 = vld [vmem:[%s1056_s5 + $0x18] sm:$0xff]  ;;  %v537_v7 = vld [vmem:[%s1056_s5 + $0x10] sm:$0xff]  ;;  %v536_v9 = vld [vmem:[%s1056_s5 + $0x8] sm:$0xff] }
  0xc3   : > { %v496_v60 = vsub.f32 %v494_v56, %v495_v58  ;;  %v605_v11 = vld [vmem:[%s1058_s7 + $0x78] sm:$0xff]  ;;  %v604_v12 = vld [vmem:[%s1058_s7 + $0x70] sm:$0xff]  ;;  %v535_v13 = vld [vmem:[%s1056_s5] sm:$0xff] }
  0xc4   : > { %738 = vmatpush.msra.mxu2 %v547_v51  ;;  %558 = vmatpush.msra.mxu0 %v547_v51  ;;  %v603_v15 = vld [vmem:[%s1058_s7 + $0x68] sm:$0xff]  ;;  %v498_v16 = vld [vmem:[%s1054_s3] sm:$0x1]  ;;  %v601_v20 = vld [vmem:[%s1058_s7 + $0x58] sm:$0xff] }
  0xc5   : > { %v497_v62 = vmax.f32 %v496_v60, 0.0  ;;  %751 = vmatpush.msra.mxu3 %v605_v11  ;;  %610 = vmatpush.msra.mxu1 %v605_v11  ;;  %v602_v18 = vld [vmem:[%s1058_s7 + $0x60] sm:$0xff]  ;;  %v600_v23 = vld [vmem:[%s1058_s7 + $0x50] sm:$0xff]  ;;  %v599_v25 = vld [vmem:[%s1058_s7 + $0x48] sm:$0xff] }
  0xc6   : > { %739 = vmatpush.msra.mxu2 %v546_v54  ;;  %559 = vmatpush.msra.mxu0 %v546_v54  ;;  %v512_v22 = vld [vmem:[%s1055_s4] sm:$0x1]  ;;  %v597_v28 = vld [vmem:[%s1058_s7 + $0x38] sm:$0xff]  ;;  %v518_v30 = vld [vmem:[#allocation2 + $0x10] sm:$0xff] }
  0xc7   : > { %v499_v0 = vadd.f32 1e-05, %v497_v62  ;;  %752 = vmatpush.msra.mxu3 %v604_v12  ;;  %611 = vmatpush.msra.mxu1 %v604_v12  ;;  %v598_v27 = vld [vmem:[%s1058_s7 + $0x40] sm:$0xff]  ;;  %v596_v32 = vld [vmem:[%s1058_s7 + $0x30] sm:$0xff]  ;;  %v595_v35 = vld [vmem:[%s1058_s7 + $0x28] sm:$0xff] }
  0xc8   : > { %740 = vmatpush.msra.mxu2 %v545_v57  ;;  %560 = vmatpush.msra.mxu0 %v545_v57  ;;  %v519_v29 = vld [vmem:[#allocation2] sm:$0xff]  ;;  %v520_v38 = vld [vmem:[#allocation2 + $0x8] sm:$0xff]  ;;  %v593_v41 = vld [vmem:[%s1058_s7 + $0x18] sm:$0xff] }
  0xc9   : > { %797 = vrsqrt.f32 %v499_v0  ;;  %vm506_vm5 = vweird.f32 %v499_v0  ;;  %753 = vmatpush.msra.mxu3 %v603_v15  ;;  %612 = vmatpush.msra.mxu1 %v603_v15  ;;  %v594_v37 = vld [vmem:[%s1058_s7 + $0x20] sm:$0xff]  ;;  %v592_v44 = vld [vmem:[%s1058_s7 + $0x10] sm:$0xff]  ;;  %v591_v45 = vld [vmem:[%s1058_s7 + $0x8] sm:$0xff] }
  0xca   : > { %741 = vmatpush.msra.mxu2 %v544_v59  ;;  %561 = vmatpush.msra.mxu0 %v544_v59  ;;  %v590_v46 = vld [vmem:[%s1058_s7] sm:$0xff] }
  0xcb   : > { %754 = vmatpush.msra.mxu3 %v602_v18  ;;  %613 = vmatpush.msra.mxu1 %v602_v18  ;;  %v795_v47 = vld [vmem:[%s1057_s6] ss:$0 sm:$0xff] }
  0xcc   : > { %742 = vmatpush.msra.mxu2 %v543_v61  ;;  %562 = vmatpush.msra.mxu0 %v543_v61  ;;  %v796_v60 = vld [vmem:[%s1059_s8] ss:$0 sm:$0xff] }
  0xcd   : > { %755 = vmatpush.msra.mxu3 %v601_v20  ;;  %614 = vmatpush.msra.mxu1 %v601_v20 }
  0xce   : > { %743 = vmatpush.msra.mxu2 %v542_v63  ;;  %563 = vmatpush.msra.mxu0 %v542_v63 }
  0xcf   : > { %v798_v4 = vpop.eup %797  ;;  %756 = vmatpush.msra.mxu3 %v600_v23  ;;  %615 = vmatpush.msra.mxu1 %v600_v23 }
  0xd0   : > { %744 = vmatpush.msra.mxu2 %v541_v1  ;;  %564 = vmatpush.msra.mxu0 %v541_v1  ;;  %v501_v6 = vmul.f32 %v798_v4, %v499_v0  ;;  %vm507_vm6 = vweird.f32 %v798_v4 }
  0xd1   : > { %vm508_vm7 = vmor %vm506_vm5, %vm507_vm6  ;;  %757 = vmatpush.msra.mxu3 %v599_v25  ;;  %616 = vmatpush.msra.mxu1 %v599_v25 }
  0xd2   : > { %745 = vmatpush.msra.mxu2 %v540_v2  ;;  %565 = vmatpush.msra.mxu0 %v540_v2  ;;  %v502_v8 = vmul.f32 %v798_v4, %v501_v6 }
  0xd3   : > { %758 = vmatpush.msra.mxu3 %v598_v27  ;;  %617 = vmatpush.msra.mxu1 %v598_v27 }
  0xd4   : > { %746 = vmatpush.msra.mxu2 %v539_v3  ;;  %566 = vmatpush.msra.mxu0 %v539_v3  ;;  %v503_v10 = vmul.f32 0.5, %v502_v8 }
  0xd5   : > { %759 = vmatpush.msra.mxu3 %v597_v28  ;;  %618 = vmatpush.msra.mxu1 %v597_v28 }
  0xd6   : > { %747 = vmatpush.msra.mxu2 %v538_v5  ;;  %567 = vmatpush.msra.mxu0 %v538_v5  ;;  %v504_v14 = vsub.f32 1.5, %v503_v10 }
  0xd7   : > { %760 = vmatpush.msra.mxu3 %v596_v32  ;;  %619 = vmatpush.msra.mxu1 %v596_v32 }
  0xd8   : > { %748 = vmatpush.msra.mxu2 %v537_v7  ;;  %568 = vmatpush.msra.mxu0 %v537_v7  ;;  %v505_v17 = vmul.f32 %v798_v4, %v504_v14 }
  0xd9   : > { %761 = vmatpush.msra.mxu3 %v595_v35  ;;  %620 = vmatpush.msra.mxu1 %v595_v35 }
  0xda   : > { %749 = vmatpush.msra.mxu2 %v536_v9  ;;  %569 = vmatpush.msra.mxu0 %v536_v9  ;;  %v509_v19 = vsel %vm508_vm7, %v798_v4, %v505_v17 }
  0xdb   : > { %v510_v21 = vmul.f32 %v509_v19, %v498_v16  ;;  %762 = vmatpush.msra.mxu3 %v594_v37  ;;  %621 = vmatpush.msra.mxu1 %v594_v37 }
  0xdc   : > { %750 = vmatpush.msra.mxu2 %v535_v13  ;;  %570 = vmatpush.msra.mxu0 %v535_v13 }
  0xdd   : > { %511 = vst [vmem:[#allocation5] sm:$0x1] %v510_v21  ;;  %v513_v24 = vmul.f32 %v510_v21, %v935_v55  ;;  %763 = vmatpush.msra.mxu3 %v593_v41  ;;  %622 = vmatpush.msra.mxu1 %v593_v41 }
  0xdf   : > { %v514_v26 = vsub.f32 %v512_v22, %v513_v24  ;;  %764 = vmatpush.msra.mxu3 %v592_v44  ;;  %623 = vmatpush.msra.mxu1 %v592_v44 }
  0xe1   : > { %515 = vst [vmem:[#allocation6] sm:$0x1] %v514_v26  ;;  %765 = vmatpush.msra.mxu3 %v591_v45  ;;  %624 = vmatpush.msra.mxu1 %v591_v45 }
  0xe3   : > { %766 = vmatpush.msra.mxu3 %v590_v46  ;;  %625 = vmatpush.msra.mxu1 %v590_v46 }
  0xe4   : > { %v793_v31 = vld [vmem:[#allocation5] ss:$0 sm:$0xff] }
  0xe5   : > { %v526_v33 = vmul.f32 %v793_v31, %v519_v29  ;;  %v525_v34 = vmul.f32 %v793_v31, %v518_v30  ;;  %v527_v42 = vmul.f32 %v793_v31, %v520_v38 }
  0xe8   : > { %v794_v36 = vld [vmem:[#allocation6] ss:$0 sm:$0xff] }
  0xe9   : > { %v533_v39 = vadd.f32 %v794_v36, %v526_v33  ;;  %v532_v40 = vadd.f32 %v794_v36, %v525_v34  ;;  %v534_v43 = vadd.f32 %v794_v36, %v527_v42 }
  0xeb   : > { %574 = vmatmul.f32.vlgmr.msra.gmra.mxu2 %v533_v39  ;;  %571 = vmatmul.f32.vlgmr.msra.gmra.mxu0 %v532_v40 }
  0xf3   : > { %577 = vmatmul.f32.gmra.mxu2 %v534_v43 }
 0x168   : > { %v572_v48 = vpop.f32.mrf.mxu0 }
 0x169   : > { %v573_v49 = vadd.f32 %v795_v47, %v572_v48 }
 0x16b   : > { %vm581_vm8 = vcmp.ge.f32.partialorder %v573_v49, 0.0  ;;  %v584_v50 = vmul.f32 0.01, %v573_v49 }
 0x16d   : > { %v587_v51 = vsel %vm581_vm8, %v573_v49, %v584_v50 }
 0x16e   : > { %v575_v52 = vpop.f32.mrf.mxu2  ;;  %626 = vmatmul.f32.vlgmr.msra.gmra.mxu1 %v587_v51 }
 0x16f   : > { %v576_v53 = vadd.f32 %v795_v47, %v575_v52 }
 0x171   : > { %vm582_vm9 = vcmp.ge.f32.partialorder %v576_v53, 0.0  ;;  %v585_v54 = vmul.f32 0.01, %v576_v53 }
 0x173   : > { %v588_v55 = vsel %vm582_vm9, %v576_v53, %v585_v54 }
 0x174   : > { %629 = vmatmul.f32.vlgmr.msra.gmra.mxu3 %v588_v55 }
 0x176   : > { %v578_v56 = vpop.f32.mrf.mxu2 }
 0x177   : > { %v579_v57 = vadd.f32 %v795_v47, %v578_v56 }
 0x179   : > { %vm583_vm10 = vcmp.ge.f32.partialorder %v579_v57, 0.0  ;;  %v586_v58 = vmul.f32 0.01, %v579_v57 }
 0x17b   : > { %v589_v59 = vsel %vm583_vm10, %v579_v57, %v586_v58 }
 0x17c   : > { %632 = vmatmul.f32.gmra.mxu3 %v589_v59 }
 0x1eb   : > { %v627_v61 = vpop.f32.mrf.mxu1 }
 0x1ec   : > { %v628_v62 = vadd.f32 %v796_v60, %v627_v61 }
 0x1ee   : > { %637 = vst.msk [vmem:[%s1060_s9] sm:$0xff] %vm636_vm11, %v628_v62 }
 0x1f7   : > { %v630_v63 = vpop.f32.mrf.mxu3 }
 0x1f8   : > { %v631_v0 = vadd.f32 %v796_v60, %v630_v63 }
 0x1fa   : > { %638 = vst.msk [vmem:[%s1060_s9 + $0x8] sm:$0xff] %vm636_vm11, %v631_v0 }
 0x1ff   : > { %v633_v1 = vpop.f32.mrf.mxu3 }
 0x200   : > { %v634_v2 = vadd.f32 %v796_v60, %v633_v1 }
 0x202   : > { %639 = vst.msk [vmem:[%s1060_s9 + $0x10] sm:$0xff] %vm636_vm11, %v634_v2 }
 0x203 PF: > { %s19_s11 = sadd.s32 1, %s821_s11   ;;  %s1061_s30 = smov %s817_s10 }
 0x204   : > { %p16_p6 = scmp.ge.s32.totalorder %s19_s11, 4   ;;  %s1062_s10 = smov %s1064_s12 }
 0x206   :  { %18 = sbr.rel (!%p16_p6) target bundleno = 2 (0x2), region = 104 }

</bundles_post_ra>
